<compile_context>
chip_gen: v6e
topology: v6e:2x2x1
jax: 0.10.0
libtpu: 0.0.40
codegen_flags: <defaults>
</compile_context>

<pallas_src>
import math

import jax
import jax.numpy as jnp
from jax.experimental import pallas as pl
from jax.experimental.pallas import tpu as pltpu


def _round_up(x, m):
    return ((x + m - 1) // m) * m


def _vmem_capacity_bytes():
    """Per-TensorCore VMEM capacity; conservative 64 MiB (v7x) fallback."""
    try:
        return int(pltpu.get_tpu_info().vmem_capacity_bytes)
    except Exception:
        return 64 * 1024 * 1024


def _make_kernel(tk, resident_weight, compute_dtype):
    def kernel(x_ref, w_ref, b_ref, o_ref, acc_ref):
        # x_ref  : (tm, tk)                  activation tile (input dtype, cast below)
        # w_ref  : (k_pad, n_pad) resident   or (tk, n_pad) streamed  (compute dtype)
        # b_ref  : (1, n_pad)                bias, f32
        # o_ref  : (tm, n_pad)               output tile, resident across the K axis
        # acc_ref: (tm, n_pad)               f32 accumulator scratch
        k = pl.program_id(1)

        if resident_weight:
            k0 = pl.multiple_of(k * tk, tk)
            w_tile = w_ref[pl.ds(k0, tk), :]
        else:
            w_tile = w_ref[...]

        x_tile = x_ref[...]
        if x_tile.dtype != compute_dtype:
            x_tile = x_tile.astype(compute_dtype)   # in-kernel cast: no extra HBM pass

        partial = jnp.dot(x_tile, w_tile, preferred_element_type=jnp.float32)

        @pl.when(k == 0)
        def _seed():                  # seed with bias: no separate zero-init pass
            acc_ref[...] = partial + b_ref[...]

        @pl.when(k > 0)
        def _accumulate():
            acc_ref[...] += partial

        @pl.when(k == pl.num_programs(1) - 1)
        def _finalize():
            o_ref[...] = jnp.maximum(acc_ref[...], 0.0).astype(o_ref.dtype)

    return kernel


def make_shallow_encoder(weight, bias, *, compute_dtype=jnp.bfloat16,
                         tm_max=256, tk_max=None):
    """One-time setup for relu(flatten(x) @ W.T + b).

    weight : (latent_dim, in_units)   PyTorch nn.Linear layout
    bias   : (latent_dim,)
    Returns apply(x_nchw) -> (B, latent_dim) float32.
    compute_dtype=jnp.float32 reproduces the PyTorch module bit-for-bit semantics;
    the bf16 default halves weight/activation DMA with f32 accumulation.
    """
    latent_dim, in_units = weight.shape
    assert bias.shape == (latent_dim,)

    if tk_max is None:
        tk_max = 8192 if jnp.dtype(compute_dtype).itemsize <= 2 else 4096

    n_pad = _round_up(latent_dim, 128)            # lane-dense output (unmasked vst)
    csize = jnp.dtype(compute_dtype).itemsize

    cap = _vmem_capacity_bytes()
    budget = cap * 3 // 4                          # ~48 MiB v7x, ~96 MiB v5e/v6e

    def _footprint(tk, resident):
        k_pad = _round_up(in_units, tk)
        # 2x: BlockSpec pipelining double-buffers inputs / outputs.
        w_bytes = 2 * (k_pad if resident else tk) * n_pad * csize
        x_bytes = 2 * tm_max * tk * 4              # x tiles stay f32 in VMEM
        acc_bytes = tm_max * n_pad * 4
        out_bytes = 2 * tm_max * n_pad * 4
        bias_bytes = 2 * n_pad * 4
        return w_bytes + x_bytes + acc_bytes + out_bytes + bias_bytes

    # Largest K tile first; prefer a fully VMEM-resident weight, else stream K-tiles.
    tk = _round_up(min(tk_max, _round_up(in_units, 128)), 128)
    resident = _footprint(tk, True) <= budget
    if not resident:
        while tk > 128 and _footprint(tk, False) > budget:
            tk = max(128, _round_up(tk // 2, 128))
    k_pad = _round_up(in_units, tk)
    grid_k = k_pad // tk
    vmem_limit = max(32 * 1024 * 1024,
                     min(budget, 2 * _footprint(tk, resident)))

    # ---- one-time parameter prep (hoisted out of the call path) -----------------
    # pad (latent, in) -> (n_pad, k_pad), transpose to (K, N), cast to compute dtype.
    w_p = jnp.pad(weight, ((0, n_pad - latent_dim), (0, k_pad - in_units)))
    w_p = jnp.asarray(w_p.T, dtype=compute_dtype)                      # (k_pad, n_pad)
    b_p = jnp.pad(bias, (0, n_pad - latent_dim)).reshape(1, n_pad).astype(jnp.float32)

    kernel = _make_kernel(tk, resident, compute_dtype)
    if resident:
        w_spec = pl.BlockSpec((k_pad, n_pad), lambda i, k: (0, 0))     # fetched once
    else:
        w_spec = pl.BlockSpec((tk, n_pad), lambda i, k: (k, 0))        # streamed K-tiles
    b_spec = pl.BlockSpec((1, n_pad), lambda i, k: (0, 0))

    def apply(x_nchw):
        B = x_nchw.shape[0]
        assert math.prod(x_nchw.shape[1:]) == in_units
        x2d = x_nchw.reshape(B, in_units)           # nn.Flatten (row-major, NCHW)
        if k_pad != in_units:
            # Reduction-axis blocks must be zero-padded for a correct accumulation.
            x2d = jnp.pad(x2d, ((0, 0), (0, k_pad - in_units)))

        tm = min(tm_max, _round_up(B, 8))           # sublane-aligned batch tile
        grid = (pl.cdiv(B, tm), grid_k)             # boundary batch rows handled by Pallas

        out = pl.pallas_call(
            kernel,
            out_shape=jax.ShapeDtypeStruct((B, n_pad), jnp.float32),
            grid=grid,
            in_specs=[
                pl.BlockSpec((tm, tk), lambda i, k: (i, k)),           # x tile
                w_spec,                                                # weight
                b_spec,                                                # bias
            ],
            out_specs=pl.BlockSpec((tm, n_pad), lambda i, k: (i, 0)),
            scratch_shapes=[pltpu.VMEM((tm, n_pad), jnp.float32)],
            compiler_params=pltpu.CompilerParams(
                dimension_semantics=("parallel", "arbitrary"),
                vmem_limit_bytes=vmem_limit,
            ),
        )(x2d, w_p, b_p)

        return out[:, :latent_dim]

    return apply


if __name__ == "__main__":
    # Shapes consistent with the module: input_shape=(4, 16, 16), latent_dim=32.
    B, C, H, W = 2, 4, 16, 16
    latent_dim = 32
    in_units = C * H * W

    key = jax.random.PRNGKey(0)
    kx, kw, kb = jax.random.split(key, 3)

    x = jax.random.normal(kx, (B, C, H, W), dtype=jnp.float32)
    bound = 1.0 / (in_units ** 0.5)
    weight = jax.random.uniform(kw, (latent_dim, in_units),
                                minval=-bound, maxval=bound, dtype=jnp.float32)
    bias = jax.random.uniform(kb, (latent_dim,),
                              minval=-bound, maxval=bound, dtype=jnp.float32)

    # Reference (PyTorch semantics) in plain JAX.
    ref = jnp.maximum(x.reshape(B, -1) @ weight.T + bias, 0.0)

    # Exact-module-semantics path (f32 weights on the MXU).
    enc_f32 = make_shallow_encoder(weight, bias, compute_dtype=jnp.float32)
    out_f32 = jax.block_until_ready(enc_f32(x))
    assert out_f32.shape == (B, latent_dim)
    assert jnp.allclose(out_f32, ref, atol=1e-4, rtol=1e-4)

    # Default perf path: bf16 weights / in-kernel bf16 cast of x, f32 accumulation.
    enc_bf16 = make_shallow_encoder(weight, bias)        # compute_dtype=bf16 default
    out_bf16 = jax.block_until_ready(enc_bf16(x))
    assert out_bf16.shape == (B, latent_dim)
    assert jnp.allclose(out_bf16, ref, atol=5e-2, rtol=5e-2)

    print("KERNEL_OK")
</pallas_src>

<mosaic_0001>
module attributes {stable_mosaic.version = 11 : i64} {
  func.func @kernel(%arg0: i32, %arg1: i32, %arg2: memref<8x1024xf32, #tpu.memory_space<vmem>>, %arg3: memref<1024x128xf32, #tpu.memory_space<vmem>>, %arg4: memref<1x128xf32, #tpu.memory_space<vmem>>, %arg5: memref<8x128xf32, #tpu.memory_space<vmem>>, %arg6: memref<8x128xf32, #tpu.memory_space<vmem>>) attributes {dimension_semantics = [#tpu.dimension_semantics<parallel>, #tpu.dimension_semantics<arbitrary>], iteration_bounds = array<i64: 1, 1>, scalar_prefetch = 0 : i64, scratch_operands = 1 : i64, tpu.core_type = #tpu.core_type<tc>, window_params = [{transform_indices = @transform_0, window_bounds = array<i64: 8, 1024>}, {pipeline_mode = #tpu.pipeline_mode<synchronous>, transform_indices = @transform_1, window_bounds = array<i64: 1024, 128>}, {pipeline_mode = #tpu.pipeline_mode<synchronous>, transform_indices = @transform_2, window_bounds = array<i64: 1, 128>}, {transform_indices = @transform_3, window_bounds = array<i64: 8, 128>}]} {
    %c1024_i32 = arith.constant 1024 : i32
    %0 = arith.muli %arg1, %c1024_i32 : i32
    %1 = tpu.assume_multiple %0, 1024 : i32
    %2 = arith.index_cast %1 : i32 to index
    %c0 = arith.constant 0 : index
    %3 = vector.load %arg3[%2, %c0] : memref<1024x128xf32, #tpu.memory_space<vmem>>, vector<1024x128xf32>
    %c0_0 = arith.constant 0 : index
    %c0_1 = arith.constant 0 : index
    %4 = vector.load %arg2[%c0_0, %c0_1] : memref<8x1024xf32, #tpu.memory_space<vmem>>, vector<8x1024xf32>
    %cst = arith.constant dense<0.000000e+00> : vector<8x128xf32>
    %5 = tpu.matmul %4, %3, %cst {dimension_numbers = #tpu.dot_dimension_numbers<[1], [0], [0], [1], [0, 0, 1, 1], [], []>} : vector<8x1024xf32>, vector<1024x128xf32>, vector<8x128xf32> -> vector<8x128xf32>
    %c0_i32 = arith.constant 0 : i32
    %6 = arith.cmpi eq, %arg1, %c0_i32 : i32
    %7 = arith.extui %6 : i1 to i32
    %c0_i32_2 = arith.constant 0 : i32
    %8 = arith.cmpi ne, %7, %c0_i32_2 : i32
    scf.if %8 {
      %c0_7 = arith.constant 0 : index
      %c0_8 = arith.constant 0 : index
      %15 = vector.load %arg4[%c0_7, %c0_8] : memref<1x128xf32, #tpu.memory_space<vmem>>, vector<1x128xf32>
      %16 = vector.broadcast %15 : vector<1x128xf32> to vector<8x128xf32>
      %17 = arith.addf %5, %16 : vector<8x128xf32>
      %c0_9 = arith.constant 0 : index
      %c0_10 = arith.constant 0 : index
      %18 = vector.load %arg6[%c0_9, %c0_10] : memref<8x128xf32, #tpu.memory_space<vmem>>, vector<8x128xf32>
      tpu.vector_store %arg6[%c0_9, %c0_10], %17 {strides = array<i32>} : memref<8x128xf32, #tpu.memory_space<vmem>>, vector<8x128xf32>,
    } else {
    }
    %c0_i32_3 = arith.constant 0 : i32
    %9 = arith.cmpi sgt, %arg1, %c0_i32_3 : i32
    %10 = arith.extui %9 : i1 to i32
    %c0_i32_4 = arith.constant 0 : i32
    %11 = arith.cmpi ne, %10, %c0_i32_4 : i32
    scf.if %11 {
      %c0_7 = arith.constant 0 : index
      %c0_8 = arith.constant 0 : index
      %15 = vector.load %arg6[%c0_7, %c0_8] : memref<8x128xf32, #tpu.memory_space<vmem>>, vector<8x128xf32>
      %16 = arith.addf %15, %5 : vector<8x128xf32>
      %c0_9 = arith.constant 0 : index
      %c0_10 = arith.constant 0 : index
      %17 = vector.load %arg6[%c0_9, %c0_10] : memref<8x128xf32, #tpu.memory_space<vmem>>, vector<8x128xf32>
      tpu.vector_store %arg6[%c0_9, %c0_10], %16 {strides = array<i32>} : memref<8x128xf32, #tpu.memory_space<vmem>>, vector<8x128xf32>,
    } else {
    }
    %c0_i32_5 = arith.constant 0 : i32
    %12 = arith.cmpi eq, %arg1, %c0_i32_5 : i32
    %13 = arith.extui %12 : i1 to i32
    %c0_i32_6 = arith.constant 0 : i32
    %14 = arith.cmpi ne, %13, %c0_i32_6 : i32
    scf.if %14 {
      %c0_7 = arith.constant 0 : index
      %c0_8 = arith.constant 0 : index
      %15 = vector.load %arg6[%c0_7, %c0_8] : memref<8x128xf32, #tpu.memory_space<vmem>>, vector<8x128xf32>
      %cst_9 = arith.constant 0.000000e+00 : f32
      %16 = vector.broadcast %cst_9 : f32 to vector<8x128xf32>
      %17 = arith.maximumf %15, %16 : vector<8x128xf32>
      %c0_10 = arith.constant 0 : index
      %c0_11 = arith.constant 0 : index
      %18 = vector.load %arg5[%c0_10, %c0_11] : memref<8x128xf32, #tpu.memory_space<vmem>>, vector<8x128xf32>
      tpu.vector_store %arg5[%c0_10, %c0_11], %17 {strides = array<i32>} : memref<8x128xf32, #tpu.memory_space<vmem>>, vector<8x128xf32>,
    } else {
    }
    return
  }
  func.func @transform_0(%arg0: i32, %arg1: i32) -> (i32, i32) {
    %c0_i32 = arith.constant 0 : i32
    return %arg0, %arg1 : i32, i32
  }
  func.func @transform_1(%arg0: i32, %arg1: i32) -> (i32, i32) {
    %c0_i32 = arith.constant 0 : i32
    %c0_i32_0 = arith.constant 0 : i32
    %c0_i32_1 = arith.constant 0 : i32
    return %c0_i32, %c0_i32_0 : i32, i32
  }
  func.func @transform_2(%arg0: i32, %arg1: i32) -> (i32, i32) {
    %c0_i32 = arith.constant 0 : i32
    %c0_i32_0 = arith.constant 0 : i32
    %c0_i32_1 = arith.constant 0 : i32
    return %c0_i32, %c0_i32_0 : i32, i32
  }
  func.func @transform_3(%arg0: i32, %arg1: i32) -> (i32, i32) {
    %c0_i32 = arith.constant 0 : i32
    %c0_i32_0 = arith.constant 0 : i32
    return %arg0, %c0_i32 : i32, i32
  }
}

</mosaic_0001>

<bundles_post_ra>
// kernel: tpu_custom_call.1
= control target key start
LH: loop header
LB: loop body
LE: loop exit
PB: predicated region body
PF: predicated region fallthrough
CT: control target
= control target key end

     0   :  { %8 = vsyncpa [#allocation4], 0  ;;  %s874_s0 = inlined_call_operand.hbm [shape: f32[2,1024], index: 0, kind: input, shape index: {}]   ;;  %s875_s1 = inlined_call_operand.hbm [shape: f32[1024,128], index: 1, kind: input, shape index: {}]   ;;  %s876_s2 = inlined_call_operand.vmem [shape: f32[1,128], index: 2, kind: input, shape index: {}]   ;;  %s877_s3 = inlined_call_operand.hbm [shape: f32[2,128], index: 3, kind: output, shape index: {}]  }
   0x1   :  { %9 = vsyncpa [#allocation7], 0 }
   0x2   :  { %10 = vsyncpa [#allocation5], 0 }
   0x3   :  { %15 = vsyncadd [#allocation4], 768  ;;  %s822_s12 = smov [#allocation3]  }
   0x4   :  { %s16_s13 = sshll.u32 %s822_s12, 4  ;;  %s17_s13 = int_to_ptr.vmem [resolvable:$true] %s16_s13 }
   0x5   :  { %s764_s14 = scalar_lea.vmem %s17_s13, 256  ;;  %s768_s15 = scalar_lea.vmem %s17_s13, 1024 }
   0x6   :  { %p765_p0 = scmp.ne.s32.totalorder %s17_s13, %s764_s14  ;;  %p769_p1 = scmp.lt.s32.totalorder %s17_s13, %s17_s13 }
   0x7   :  { %p770_p2 = scmp.lt.s32.totalorder %s768_s15, %s764_s14 }
   0x9   :  { %p771_p3 = por %p770_p2, %p769_p1 }
   0xb   :  { %p772_p4 = pnand %p771_p3, %p765_p0 }
   0xd   :  { %775 = shalt.err (!%p772_p4)
}
   0xe   :  { %s823_s16 = smov 256   ;;  %s824_s17 = smov 16  }
   0xf   :  { %22 = dma.hbm_to_vmem [thread:$0]  %s874_s0, 256, %s17_s13, [#allocation4], %s823_s16, %s823_s16, %s824_s17  }
  0x10   :  { %s825_s20 = smov [#allocation6]  }
  0x11   :  { %s28_s21 = sshll.u32 %s825_s20, 4  ;;  %s29_s21 = int_to_ptr.vmem [resolvable:$true] %s28_s21 }
  0x12   :  { %s784_s22 = scalar_lea.vmem %s29_s21, 16384  ;;  %p789_p6 = scmp.lt.s32.totalorder %s29_s21, %s29_s21 }
  0x13   :  { %p785_p5 = scmp.ne.s32.totalorder %s29_s21, %s784_s22  ;;  %p790_p7 = scmp.lt.s32.totalorder %s784_s22, %s784_s22 }
  0x15   :  { %p791_p8 = por %p790_p7, %p789_p6 }
  0x17   :  { %p792_p9 = pnand %p791_p8, %p785_p5 }
  0x19   :  { %795 = shalt.err (!%p792_p9)
}
  0x1a   :  { %s826_s23 = smov 128   ;;  %s827_s24 = smov 8  }
  0x1b   :  { %34 = dma.hbm_to_vmem [thread:$0]  %s875_s1, 16384, %s29_s21, [#allocation7], %s826_s23, %s826_s23, %s827_s24  }
  0x1c   :  { %816 = dma.done.wait [#allocation4], 1024  }
  0x1d   :  { %817 = vsyncadd [#allocation4], 4294966272 }
  0x1e   :  { %818 = dma.done.wait [#allocation7], 16384  }
  0x1f   :  { %819 = vsyncadd [#allocation7], 4294950912  ;;  %v76_v0 = vld [vmem:[#allocation6 + $0xf8] sm:$0xff]  ;;  %v75_v4 = vld [vmem:[#allocation6 + $0xf0] sm:$0xff]  ;;  %v828_v30 = vmov 1983009808   ;;  %v196_v32 = vlaneseq }
  0x20   :  { %v108_v1 = vld [vmem:[#allocation6 + $0x1f8] sm:$0xff]  ;;  %594 = vmatprep.subr.mxu0 %v76_v0  ;;  %v107_v5 = vld [vmem:[#allocation6 + $0x1f0] sm:$0xff]  ;;  %v74_v8 = vld [vmem:[#allocation6 + $0xe8] sm:$0xff]  ;;  %v194_v31 = vunpack.c.l.s4 %v828_v30 }
  0x21   :  { %v60_v2 = vld [vmem:[#allocation6 + $0x78] sm:$0xff]  ;;  %629 = vmatprep.subr.mxu1 %v108_v1  ;;  %v59_v6 = vld [vmem:[#allocation6 + $0x70] sm:$0xff]  ;;  %v106_v9 = vld [vmem:[#allocation6 + $0x1e8] sm:$0xff]  ;;  %v197_v42 = vshrl.u32 %v196_v32, 7 }
  0x22   :  { %v92_v3 = vld [vmem:[#allocation6 + $0x178] sm:$0xff]  ;;  %595 = vmatpush3.msra.mxu0 %v60_v2  ;;  %v91_v7 = vld [vmem:[#allocation6 + $0x170] sm:$0xff]  ;;  %v58_v10 = vld [vmem:[#allocation6 + $0x68] sm:$0xff]  ;;  %v195_v41 = vunpack.c.0.s8 %v194_v31 }
  0x23   :  { %630 = vmatpush3.msra.mxu1 %v92_v3  ;;  %596 = vmatprep.subr.mxu0 %v75_v4  ;;  %v90_v11 = vld [vmem:[#allocation6 + $0x168] sm:$0xff]  ;;  %v73_v12 = vld [vmem:[#allocation6 + $0xe0] sm:$0xff]  ;;  %v72_v16 = vld [vmem:[#allocation6 + $0xd8] sm:$0xff] }
  0x24   :  { %631 = vmatprep.subr.mxu1 %v107_v5  ;;  %597 = vmatpush3.msra.mxu0 %v59_v6  ;;  %v105_v13 = vld [vmem:[#allocation6 + $0x1e0] sm:$0xff]  ;;  %v104_v17 = vld [vmem:[#allocation6 + $0x1d8] sm:$0xff]  ;;  %v71_v20 = vld [vmem:[#allocation6 + $0xd0] sm:$0xff]  ;;  %v858_v55 = vsub.s32 %v195_v41, %v197_v42 }
  0x25   :  { %632 = vmatpush3.msra.mxu1 %v91_v7  ;;  %598 = vmatprep.subr.mxu0 %v74_v8  ;;  %v57_v14 = vld [vmem:[#allocation6 + $0x60] sm:$0xff]  ;;  %v56_v18 = vld [vmem:[#allocation6 + $0x58] sm:$0xff]  ;;  %v103_v21 = vld [vmem:[#allocation6 + $0x1d0] sm:$0xff] }
  0x26   :  { %633 = vmatprep.subr.mxu1 %v106_v9  ;;  %v89_v15 = vld [vmem:[#allocation6 + $0x160] sm:$0xff]  ;;  %599 = vmatpush3.msra.mxu0 %v58_v10  ;;  %v88_v19 = vld [vmem:[#allocation6 + $0x158] sm:$0xff]  ;;  %v55_v22 = vld [vmem:[#allocation6 + $0x50] sm:$0xff] }
  0x27   :  { %634 = vmatpush3.msra.mxu1 %v90_v11  ;;  %600 = vmatprep.subr.mxu0 %v73_v12  ;;  %v87_v23 = vld [vmem:[#allocation6 + $0x150] sm:$0xff]  ;;  %v70_v24 = vld [vmem:[#allocation6 + $0xc8] sm:$0xff]  ;;  %v69_v28 = vld [vmem:[#allocation6 + $0xc0] sm:$0xff] }
  0x28   :  { %635 = vmatprep.subr.mxu1 %v105_v13  ;;  %601 = vmatpush3.msra.mxu0 %v57_v14  ;;  %v102_v25 = vld [vmem:[#allocation6 + $0x1c8] sm:$0xff]  ;;  %v101_v29 = vld [vmem:[#allocation6 + $0x1c0] sm:$0xff]  ;;  %v68_v35 = vld [vmem:[#allocation6 + $0xb8] sm:$0xff] }
  0x29   :  { %636 = vmatpush3.msra.mxu1 %v89_v15  ;;  %602 = vmatprep.subr.mxu0 %v72_v16  ;;  %v54_v26 = vld [vmem:[#allocation6 + $0x48] sm:$0xff]  ;;  %v53_v33 = vld [vmem:[#allocation6 + $0x40] sm:$0xff]  ;;  %v100_v36 = vld [vmem:[#allocation6 + $0x1b8] sm:$0xff] }
  0x2a   :  { %637 = vmatprep.subr.mxu1 %v104_v17  ;;  %603 = vmatpush3.msra.mxu0 %v56_v18  ;;  %v86_v27 = vld [vmem:[#allocation6 + $0x148] sm:$0xff]  ;;  %v85_v34 = vld [vmem:[#allocation6 + $0x140] sm:$0xff]  ;;  %v52_v37 = vld [vmem:[#allocation6 + $0x38] sm:$0xff] }
  0x2b   :  { %638 = vmatpush3.msra.mxu1 %v88_v19  ;;  %604 = vmatprep.subr.mxu0 %v71_v20  ;;  %v84_v38 = vld [vmem:[#allocation6 + $0x138] sm:$0xff]  ;;  %v67_v39 = vld [vmem:[#allocation6 + $0xb0] sm:$0xff]  ;;  %v66_v45 = vld [vmem:[#allocation6 + $0xa8] sm:$0xff] }
  0x2c   :  { %639 = vmatprep.subr.mxu1 %v103_v21  ;;  %605 = vmatpush3.msra.mxu0 %v55_v22  ;;  %v99_v40 = vld [vmem:[#allocation6 + $0x1b0] sm:$0xff]  ;;  %v98_v46 = vld [vmem:[#allocation6 + $0x1a8] sm:$0xff]  ;;  %v65_v49 = vld [vmem:[#allocation6 + $0xa0] sm:$0xff] }
  0x2d   :  { %640 = vmatpush3.msra.mxu1 %v87_v23  ;;  %606 = vmatprep.subr.mxu0 %v70_v24  ;;  %v51_v43 = vld [vmem:[#allocation6 + $0x30] sm:$0xff]  ;;  %v50_v47 = vld [vmem:[#allocation6 + $0x28] sm:$0xff]  ;;  %v97_v50 = vld [vmem:[#allocation6 + $0x1a0] sm:$0xff] }
  0x2e   :  { %641 = vmatprep.subr.mxu1 %v102_v25  ;;  %607 = vmatpush3.msra.mxu0 %v54_v26  ;;  %v83_v44 = vld [vmem:[#allocation6 + $0x130] sm:$0xff]  ;;  %v82_v48 = vld [vmem:[#allocation6 + $0x128] sm:$0xff]  ;;  %v49_v51 = vld [vmem:[#allocation6 + $0x20] sm:$0xff] }
  0x2f   :  { %642 = vmatpush3.msra.mxu1 %v86_v27  ;;  %608 = vmatprep.subr.mxu0 %v69_v28  ;;  %v81_v52 = vld [vmem:[#allocation6 + $0x120] sm:$0xff]  ;;  %v64_v53 = vld [vmem:[#allocation6 + $0x98] sm:$0xff]  ;;  %v63_v62 = vld [vmem:[#allocation6 + $0x90] sm:$0xff] }
  0x30   :  { %643 = vmatprep.subr.mxu1 %v101_v29  ;;  %609 = vmatpush3.msra.mxu0 %v53_v33  ;;  %v96_v54 = vld [vmem:[#allocation6 + $0x198] sm:$0xff]  ;;  %v744_v57 = vld [vmem:[#allocation3] ss:$16 sps:$4 sm:$0xff]   ;;  %v748_v60 = vld [vmem:[#allocation3 + $0x4] ss:$16 sps:$4 sm:$0xff]  }
  0x31   :  { %644 = vmatpush3.msra.mxu1 %v85_v34  ;;  %610 = vmatprep.subr.mxu0 %v68_v35  ;;  %v48_v56 = vld [vmem:[#allocation6 + $0x18] sm:$0xff]  ;;  %v746_v58 = vld [vmem:[#allocation3 + $0x20] ss:$16 sps:$4 sm:$0xff]   ;;  %v749_v61 = vld [vmem:[#allocation3 + $0x24] ss:$16 sps:$4 sm:$0xff]   ;;  %v199_v0 = vrot.slane %v744_v57, %v858_v55  ;;  %v206_v4 = vrot.slane %v748_v60, %v858_v55 }
  0x32   :  { %645 = vmatprep.subr.mxu1 %v100_v36  ;;  %611 = vmatpush3.msra.mxu0 %v52_v37  ;;  %v80_v59 = vld [vmem:[#allocation6 + $0x118] sm:$0xff]  ;;  %v95_v63 = vld [vmem:[#allocation6 + $0x190] sm:$0xff]  ;;  %v213_v1 = vrot.slane %v746_v58, %v858_v55  ;;  %v220_v5 = vrot.slane %v749_v61, %v858_v55  ;;  %v62_v6 = vld [vmem:[#allocation6 + $0x88] sm:$0xff] }
  0x33   :  { %646 = vmatpush3.msra.mxu1 %v84_v38  ;;  %612 = vmatprep.subr.mxu0 %v67_v39  ;;  %v47_v2 = vld [vmem:[#allocation6 + $0x10] sm:$0xff]  ;;  %v94_v7 = vld [vmem:[#allocation6 + $0x188] sm:$0xff]  ;;  %v61_v10 = vld [vmem:[#allocation6 + $0x80] sm:$0xff] }
  0x34   :  { %647 = vmatprep.subr.mxu1 %v99_v40  ;;  %613 = vmatpush3.msra.mxu0 %v51_v43  ;;  %v79_v3 = vld [vmem:[#allocation6 + $0x110] sm:$0xff]  ;;  %v46_v8 = vld [vmem:[#allocation6 + $0x8] sm:$0xff]  ;;  %v93_v11 = vld [vmem:[#allocation6 + $0x180] sm:$0xff]  ;;  %v222_v12 = vcombine.high %v199_v0, %v213_v1  ;;  %v224_v14 = vcombine.high %v206_v4, %v220_v5  ;;  %v221_v16 = vcombine.low %v199_v0, %v213_v1 }
  0x35   :  { %648 = vmatpush3.msra.mxu1 %v83_v44  ;;  %614 = vmatprep.subr.mxu0 %v66_v45  ;;  %v78_v9 = vld [vmem:[#allocation6 + $0x108] sm:$0xff]  ;;  %v45_v13 = vld [vmem:[#allocation6] sm:$0xff]  ;;  %v223_v17 = vcombine.low %v206_v4, %v220_v5  ;;  %v140_v18 = vld [vmem:[#allocation6 + $0x2f8] sm:$0xff] }
  0x36   :  { %649 = vmatprep.subr.mxu1 %v98_v46  ;;  %615 = vmatpush3.msra.mxu0 %v50_v47  ;;  %v77_v15 = vld [vmem:[#allocation6 + $0x100] sm:$0xff]  ;;  %v172_v19 = vld [vmem:[#allocation6 + $0x3f8] sm:$0xff]  ;;  %v139_v22 = vld [vmem:[#allocation6 + $0x2f0] sm:$0xff] }
  0x37   :  { %650 = vmatpush3.msra.mxu1 %v82_v48  ;;  %616 = vmatprep.subr.mxu0 %v65_v49  ;;  %v124_v20 = vld [vmem:[#allocation6 + $0x278] sm:$0xff]  ;;  %v171_v23 = vld [vmem:[#allocation6 + $0x3f0] sm:$0xff]  ;;  %v138_v26 = vld [vmem:[#allocation6 + $0x2e8] sm:$0xff] }
  0x38   :  { %651 = vmatprep.subr.mxu1 %v97_v50  ;;  %617 = vmatpush3.msra.mxu0 %v49_v51  ;;  %v156_v21 = vld [vmem:[#allocation6 + $0x378] sm:$0xff]  ;;  %v123_v24 = vld [vmem:[#allocation6 + $0x270] sm:$0xff]  ;;  %v170_v27 = vld [vmem:[#allocation6 + $0x3e8] sm:$0xff] }
  0x39   :  { %652 = vmatpush3.msra.mxu1 %v81_v52  ;;  %618 = vmatprep.subr.mxu0 %v64_v53  ;;  %v155_v25 = vld [vmem:[#allocation6 + $0x370] sm:$0xff]  ;;  %v122_v28 = vld [vmem:[#allocation6 + $0x268] sm:$0xff]  ;;  %v137_v30 = vld [vmem:[#allocation6 + $0x2e0] sm:$0xff] }
  0x3a   :  { %653 = vmatprep.subr.mxu1 %v96_v54  ;;  %619 = vmatpush3.msra.mxu0 %v48_v56  ;;  %v154_v29 = vld [vmem:[#allocation6 + $0x368] sm:$0xff]  ;;  %v169_v31 = vld [vmem:[#allocation6 + $0x3e0] sm:$0xff]  ;;  %v136_v34 = vld [vmem:[#allocation6 + $0x2d8] sm:$0xff] }
  0x3b   :  { %654 = vmatpush3.msra.mxu1 %v80_v59  ;;  %620 = vmatprep.subr.mxu0 %v63_v62  ;;  %v121_v32 = vld [vmem:[#allocation6 + $0x260] sm:$0xff]  ;;  %v168_v35 = vld [vmem:[#allocation6 + $0x3d8] sm:$0xff]  ;;  %v135_v38 = vld [vmem:[#allocation6 + $0x2d0] sm:$0xff] }
  0x3c   :  { %655 = vmatprep.subr.mxu1 %v95_v63  ;;  %621 = vmatpush3.msra.mxu0 %v47_v2  ;;  %v153_v33 = vld [vmem:[#allocation6 + $0x360] sm:$0xff]  ;;  %v120_v36 = vld [vmem:[#allocation6 + $0x258] sm:$0xff]  ;;  %v167_v39 = vld [vmem:[#allocation6 + $0x3d0] sm:$0xff] }
  0x3d   :  { %656 = vmatpush3.msra.mxu1 %v79_v3  ;;  %622 = vmatprep.subr.mxu0 %v62_v6  ;;  %v152_v37 = vld [vmem:[#allocation6 + $0x358] sm:$0xff]  ;;  %v119_v40 = vld [vmem:[#allocation6 + $0x250] sm:$0xff]  ;;  %v134_v42 = vld [vmem:[#allocation6 + $0x2c8] sm:$0xff] }
  0x3e   :  { %657 = vmatprep.subr.mxu1 %v94_v7  ;;  %623 = vmatpush3.msra.mxu0 %v46_v8  ;;  %v151_v41 = vld [vmem:[#allocation6 + $0x350] sm:$0xff]  ;;  %v166_v43 = vld [vmem:[#allocation6 + $0x3c8] sm:$0xff]  ;;  %v133_v46 = vld [vmem:[#allocation6 + $0x2c0] sm:$0xff] }
  0x3f   :  { %658 = vmatpush3.msra.mxu1 %v78_v9  ;;  %624 = vmatprep.subr.mxu0 %v61_v10  ;;  %v118_v44 = vld [vmem:[#allocation6 + $0x248] sm:$0xff]  ;;  %v165_v47 = vld [vmem:[#allocation6 + $0x3c0] sm:$0xff]  ;;  %v132_v50 = vld [vmem:[#allocation6 + $0x2b8] sm:$0xff] }
  0x40   :  { %659 = vmatprep.subr.mxu1 %v93_v11  ;;  %625 = vmatpush3.msra.mxu0 %v45_v13  ;;  %v150_v45 = vld [vmem:[#allocation6 + $0x348] sm:$0xff]  ;;  %v117_v48 = vld [vmem:[#allocation6 + $0x240] sm:$0xff]  ;;  %v164_v51 = vld [vmem:[#allocation6 + $0x3b8] sm:$0xff] }
  0x41   :  { %333 = vmatprep.mubr.f32.mxu0 %v222_v12  ;;  %660 = vmatpush3.msra.mxu1 %v77_v15  ;;  %v149_v49 = vld [vmem:[#allocation6 + $0x340] sm:$0xff]  ;;  %v116_v52 = vld [vmem:[#allocation6 + $0x238] sm:$0xff]  ;;  %v131_v54 = vld [vmem:[#allocation6 + $0x2b0] sm:$0xff] }
  0x42   :  { %403 = vmatprep.mubr.f32.mxu1 %v224_v14  ;;  %334 = vmatmul.mubr.f32.vlgmr.msra.gmra.mxu0 %v221_v16  ;;  %v148_v53 = vld [vmem:[#allocation6 + $0x338] sm:$0xff]  ;;  %v163_v56 = vld [vmem:[#allocation6 + $0x3b0] sm:$0xff]  ;;  %v130_v59 = vld [vmem:[#allocation6 + $0x2a8] sm:$0xff] }
  0x43   :  { %404 = vmatmul.mubr.f32.vlgmr.msra.gmra.mxu1 %v223_v17  ;;  %664 = vmatprep.subr.mxu0 %v140_v18  ;;  %v115_v57 = vld [vmem:[#allocation6 + $0x230] sm:$0xff]  ;;  %v162_v60 = vld [vmem:[#allocation6 + $0x3a8] sm:$0xff]  ;;  %v129_v63 = vld [vmem:[#allocation6 + $0x2a0] sm:$0xff] }
  0x44   :  { %699 = vmatprep.subr.mxu1 %v172_v19  ;;  %665 = vmatpush3.msra.mxu0 %v124_v20  ;;  %v147_v58 = vld [vmem:[#allocation6 + $0x330] sm:$0xff]  ;;  %v114_v61 = vld [vmem:[#allocation6 + $0x228] sm:$0xff]  ;;  %v161_v0 = vld [vmem:[#allocation6 + $0x3a0] sm:$0xff] }
  0x45   :  { %700 = vmatpush3.msra.mxu1 %v156_v21  ;;  %666 = vmatprep.subr.mxu0 %v139_v22  ;;  %v146_v62 = vld [vmem:[#allocation6 + $0x328] sm:$0xff]  ;;  %v113_v1 = vld [vmem:[#allocation6 + $0x220] sm:$0xff]  ;;  %v128_v7 = vld [vmem:[#allocation6 + $0x298] sm:$0xff] }
  0x46   :  { %701 = vmatprep.subr.mxu1 %v171_v23  ;;  %667 = vmatpush3.msra.mxu0 %v123_v24  ;;  %v750_v2 = vld [vmem:[#allocation3 + $0x8] ss:$16 sps:$4 sm:$0xff]   ;;  %v145_v4 = vld [vmem:[#allocation6 + $0x320] sm:$0xff]  ;;  %v754_v5 = vld [vmem:[#allocation3 + $0xc] ss:$16 sps:$4 sm:$0xff]  }
  0x47   :  { %702 = vmatpush3.msra.mxu1 %v155_v25  ;;  %668 = vmatprep.subr.mxu0 %v138_v26  ;;  %v752_v3 = vld [vmem:[#allocation3 + $0x28] ss:$16 sps:$4 sm:$0xff]   ;;  %v755_v6 = vld [vmem:[#allocation3 + $0x2c] ss:$16 sps:$4 sm:$0xff]   ;;  %v127_v11 = vld [vmem:[#allocation6 + $0x290] sm:$0xff]  ;;  %v235_v13 = vrot.slane %v750_v2, %v858_v55  ;;  %v242_v17 = vrot.slane %v754_v5, %v858_v55 }
  0x48   :  { %703 = vmatprep.subr.mxu1 %v170_v27  ;;  %669 = vmatpush3.msra.mxu0 %v122_v28  ;;  %v160_v8 = vld [vmem:[#allocation6 + $0x398] sm:$0xff]  ;;  %v159_v12 = vld [vmem:[#allocation6 + $0x390] sm:$0xff]  ;;  %v249_v14 = vrot.slane %v752_v3, %v858_v55  ;;  %v256_v18 = vrot.slane %v755_v6, %v858_v55  ;;  %v126_v19 = vld [vmem:[#allocation6 + $0x288] sm:$0xff] }
  0x49   :  { %704 = vmatpush3.msra.mxu1 %v154_v29  ;;  %670 = vmatprep.subr.mxu0 %v137_v30  ;;  %v112_v9 = vld [vmem:[#allocation6 + $0x218] sm:$0xff]  ;;  %v111_v15 = vld [vmem:[#allocation6 + $0x210] sm:$0xff]  ;;  %v158_v20 = vld [vmem:[#allocation6 + $0x388] sm:$0xff] }
  0x4a   :  { %705 = vmatprep.subr.mxu1 %v169_v31  ;;  %671 = vmatpush3.msra.mxu0 %v121_v32  ;;  %v144_v10 = vld [vmem:[#allocation6 + $0x318] sm:$0xff]  ;;  %v143_v16 = vld [vmem:[#allocation6 + $0x310] sm:$0xff]  ;;  %v110_v21 = vld [vmem:[#allocation6 + $0x208] sm:$0xff]  ;;  %v258_v25 = vcombine.high %v235_v13, %v249_v14  ;;  %v260_v27 = vcombine.high %v242_v17, %v256_v18  ;;  %v257_v28 = vcombine.low %v235_v13, %v249_v14 }
  0x4b   :  { %706 = vmatpush3.msra.mxu1 %v153_v33  ;;  %672 = vmatprep.subr.mxu0 %v136_v34  ;;  %v142_v22 = vld [vmem:[#allocation6 + $0x308] sm:$0xff]  ;;  %v125_v23 = vld [vmem:[#allocation6 + $0x280] sm:$0xff]  ;;  %v259_v29 = vcombine.low %v242_v17, %v256_v18 }
  0x4c   :  { %707 = vmatprep.subr.mxu1 %v168_v35  ;;  %673 = vmatpush3.msra.mxu0 %v120_v36  ;;  %v157_v24 = vld [vmem:[#allocation6 + $0x380] sm:$0xff] }
  0x4d   :  { %708 = vmatpush3.msra.mxu1 %v152_v37  ;;  %674 = vmatprep.subr.mxu0 %v135_v38  ;;  %v109_v26 = vld [vmem:[#allocation6 + $0x200] sm:$0xff] }
  0x4e   :  { %709 = vmatprep.subr.mxu1 %v167_v39  ;;  %675 = vmatpush3.msra.mxu0 %v119_v40  ;;  %v141_v55 = vld [vmem:[#allocation6 + $0x300] sm:$0xff] }
  0x4f   :  { %710 = vmatpush3.msra.mxu1 %v151_v41  ;;  %676 = vmatprep.subr.mxu0 %v134_v42 }
  0x50   :  { %711 = vmatprep.subr.mxu1 %v166_v43  ;;  %677 = vmatpush3.msra.mxu0 %v118_v44  ;;  %v593_v44 = vld [vmem:[%s876_s2] ss:$0 sm:$0xff] }
  0x51   :  { %712 = vmatpush3.msra.mxu1 %v150_v45  ;;  %678 = vmatprep.subr.mxu0 %v133_v46 }
  0x52   :  { %713 = vmatprep.subr.mxu1 %v165_v47  ;;  %679 = vmatpush3.msra.mxu0 %v117_v48 }
  0x53   :  { %714 = vmatpush3.msra.mxu1 %v149_v49  ;;  %680 = vmatprep.subr.mxu0 %v132_v50 }
  0x54   :  { %715 = vmatprep.subr.mxu1 %v164_v51  ;;  %681 = vmatpush3.msra.mxu0 %v116_v52 }
  0x55   :  { %716 = vmatpush3.msra.mxu1 %v148_v53  ;;  %682 = vmatprep.subr.mxu0 %v131_v54 }
  0x56   :  { %717 = vmatprep.subr.mxu1 %v163_v56  ;;  %683 = vmatpush3.msra.mxu0 %v115_v57 }
  0x57   :  { %718 = vmatpush3.msra.mxu1 %v147_v58  ;;  %684 = vmatprep.subr.mxu0 %v130_v59 }
  0x58   :  { %719 = vmatprep.subr.mxu1 %v162_v60  ;;  %685 = vmatpush3.msra.mxu0 %v114_v61 }
  0x59   :  { %720 = vmatpush3.msra.mxu1 %v146_v62  ;;  %686 = vmatprep.subr.mxu0 %v129_v63 }
  0x5a   :  { %721 = vmatprep.subr.mxu1 %v161_v0  ;;  %687 = vmatpush3.msra.mxu0 %v113_v1 }
  0x5b   :  { %722 = vmatpush3.msra.mxu1 %v145_v4  ;;  %688 = vmatprep.subr.mxu0 %v128_v7 }
  0x5c   :  { %723 = vmatprep.subr.mxu1 %v160_v8  ;;  %689 = vmatpush3.msra.mxu0 %v112_v9 }
  0x5d   :  { %724 = vmatpush3.msra.mxu1 %v144_v10  ;;  %690 = vmatprep.subr.mxu0 %v127_v11 }
  0x5e   :  { %725 = vmatprep.subr.mxu1 %v159_v12  ;;  %691 = vmatpush3.msra.mxu0 %v111_v15 }
  0x5f   :  { %726 = vmatpush3.msra.mxu1 %v143_v16  ;;  %692 = vmatprep.subr.mxu0 %v126_v19 }
  0x60   :  { %727 = vmatprep.subr.mxu1 %v158_v20  ;;  %693 = vmatpush3.msra.mxu0 %v110_v21 }
  0x61   :  { %728 = vmatpush3.msra.mxu1 %v142_v22  ;;  %694 = vmatprep.subr.mxu0 %v125_v23 }
  0x62   :  { %729 = vmatprep.subr.mxu1 %v157_v24  ;;  %695 = vmatpush3.msra.mxu0 %v109_v26 }
  0x63   :  { %473 = vmatprep.mubr.f32.mxu0 %v258_v25  ;;  %730 = vmatpush3.msra.mxu1 %v141_v55 }
  0x64   :  { %543 = vmatprep.mubr.f32.mxu1 %v260_v27  ;;  %474 = vmatmul.mubr.f32.vlgmr.msra.gmra.mxu0 %v257_v28 }
  0x65   :  { %544 = vmatmul.mubr.f32.vlgmr.msra.gmra.mxu1 %v259_v29 }
 0x102   :  { %v626_v30 = vpop.f32.mrf.mxu0 }
 0x103   :  { %v661_v31 = vpop.f32.mrf.mxu1 }
 0x104   :  { %v627_v32 = vpop.f32.mrf.mxu0 }
 0x105   :  { %v662_v33 = vpop.f32.mrf.mxu1  ;;  %v628_v34 = vadd.f32 %v627_v32, %v626_v30 }
 0x106   :  { %v663_v35 = vadd.f32 %v662_v33, %v661_v31 }
 0x108   :  { %v406_v40 = vadd.f32 %v663_v35, %v628_v34 }
 0x124   :  { %v696_v36 = vpop.f32.mrf.mxu0 }
 0x125   :  { %v731_v37 = vpop.f32.mrf.mxu1 }
 0x126   :  { %v697_v38 = vpop.f32.mrf.mxu0 }
 0x127   :  { %v732_v39 = vpop.f32.mrf.mxu1  ;;  %v698_v41 = vadd.f32 %v697_v38, %v696_v36 }
 0x128   :  { %v733_v43 = vadd.f32 %v732_v39, %v731_v37 }
 0x129   :  { %v476_v42 = vadd.f32 %v698_v41, %v406_v40 }
 0x12b   :  { %v546_v45 = vadd.f32 %v733_v43, %v476_v42 }
 0x12d   :  { %v560_v46 = vadd.f32 %v593_v44, %v546_v45 }
 0x12f   :  { %v573_v47 = vmax.f32 %v560_v46, 0.0 }
 0x131   :  { %574 = vst [vmem:[#allocation8] sm:$0xff] %v573_v47 }
 0x132   :  { %579 = vsyncadd [#allocation5], 96  ;;  %s829_s27 = smov [#allocation8]  }
 0x133   :  { %s580_s28 = sshll.u32 %s829_s27, 4  ;;  %s581_s28 = int_to_ptr.vmem [resolvable:$true] %s580_s28 }
 0x134   :  { %s796_s29 = scalar_lea.vmem %s581_s28, 32  ;;  %s800_s30 = scalar_lea.vmem %s581_s28, 128 }
 0x135   :  { %p797_p10 = scmp.ne.s32.totalorder %s581_s28, %s796_s29  ;;  %p801_p11 = scmp.lt.s32.totalorder %s581_s28, %s581_s28 }
 0x136   :  { %p802_p12 = scmp.lt.s32.totalorder %s800_s30, %s796_s29 }
 0x138   :  { %p803_p13 = por %p802_p12, %p801_p11 }
 0x13a   :  { %p804_p0 = pnand %p803_p13, %p797_p10 }
 0x13c   :  { %807 = shalt.err (!%p804_p0)
}
 0x13d   :  { %s830_s4 = smov 32   ;;  %s831_s5 = smov 2  }
 0x13e   :  { %586 = dma.vmem_to_hbm [thread:$0]  %s581_s28, 32, %s877_s3, [#allocation5], %s830_s4, %s830_s4, %s831_s5  }
 0x13f   :  { %820 = dma.done.wait [#allocation5], 128  }
 0x140   :  { %821 = vsyncadd [#allocation5], 4294967168 }
 0x141   :  { %590 = vsyncpa [#allocation4], 1 }
 0x142   :  { %591 = vsyncpa [#allocation7], 1 }
 0x143   :  { %592 = vsyncpa [#allocation5], 1 }

</bundles_post_ra>
